<compile_context>
chip_gen: v5e
topology: v5e:2x2
jax: 0.10.0
libtpu: 0.0.40
codegen_flags: <defaults>
</compile_context>

<pallas_src>
import jax
import jax.numpy as jnp
from jax import lax
from jax.experimental import pallas as pl
from jax.experimental.pallas import tpu as pltpu


_INV_SQRT2 = 0.7071067811865476


def _round_up(x, m):
    return ((x + m - 1) // m) * m


def _vmem_capacity_bytes():
    """Physical VMEM per TensorCore; conservative (v7x-sized) fallback if unknown."""
    try:
        return int(pltpu.get_tpu_info().vmem_capacity_bytes)
    except Exception:
        return 64 << 20


_BUFFERED1_OK = None


def _supports_buffered_1():
    """Feature-detect pl.Buffered(1) (single-buffered constant-index blocks)."""
    global _BUFFERED1_OK
    if _BUFFERED1_OK is None:
        ok = False
        if hasattr(pl, "Buffered"):
            def _probe(a_ref, o_ref):
                o_ref[...] = a_ref[...]
            try:
                a = jnp.zeros((8, 128), jnp.float32)
                r = pl.pallas_call(
                    _probe,
                    out_shape=jax.ShapeDtypeStruct((8, 128), jnp.float32),
                    grid=(1,),
                    in_specs=[pl.BlockSpec((8, 128), lambda i: (0, 0),
                                           pipeline_mode=pl.Buffered(1))],
                    out_specs=pl.BlockSpec((8, 128), lambda i: (0, 0)),
                )(a)
                jax.block_until_ready(r)
                ok = True
            except Exception:
                ok = False
        _BUFFERED1_OK = ok
    return _BUFFERED1_OK


def _pick_tm(rows, tile_m):
    """MXU-friendly row tile: prefer dividing rows exactly; >=2 tiles for megacore."""
    tm = int(min(tile_m, _round_up(rows, 8)))
    if rows > 8 and tm >= rows:
        tm = _round_up((rows + 1) // 2, 8)   # at least 2 row tiles (v7x has 2 TCs)
    if rows % tm != 0:
        lo = max((tm * 3) // 4, 8)
        for cand in range(tm, lo - 1, -8):
            if rows % cand == 0:
                return cand
    return tm


def _pick_sub(th):
    """Hidden sub-tile width processed per inner step (bounds f32 intermediates)."""
    if th <= 512 or th % 128 != 0:
        return th
    for c in range(512, th, 128):
        if th % c == 0:
            return c
    return th


def _pick_hidden_tile(hidden, dim, w_itemsize, weight_budget_bytes, buf_factor):
    """Largest divisor of hidden whose W1v/W1g/W2 column slices fit the budget."""
    if hidden % 128 != 0:
        return hidden                         # tiny / odd hidden: keep fully resident
    per_col = buf_factor * (3 * dim + 2) * w_itemsize
    max_th = int(weight_budget_bytes // per_col) if weight_budget_bytes > 0 else 0
    if max_th >= hidden:
        return hidden
    gran = 256 if hidden % 256 == 0 else 128  # 256-granular K/N suits v6e/v7x MXU
    c = max((min(max_th, hidden) // gran) * gran, gran)
    while c >= gran:
        if hidden % c == 0:
            return c
        c -= gran
    return gran


def _plan(rows, dim, hidden, x_itemsize, w_itemsize, tile_m, vmem_limit, buf_factor):
    def plan_for_tm(tm):
        act = 4 * tm * dim * x_itemsize                      # x + out tiles, 2x buffered
        inter = tm * dim * 4 + 3 * tm * min(hidden, 1024) * 4  # acc + a/g/y sub-tiles
        headroom = 6 << 20
        wbudget = vmem_limit - act - inter - headroom
        return _pick_hidden_tile(hidden, dim, w_itemsize, wbudget, buf_factor)

    tm = _pick_tm(rows, tile_m)
    th = plan_for_tm(tm)
    n_chunks = hidden // th
    # Chunked regime (weights re-streamed per row tile): a larger row tile raises
    # arithmetic intensity vs. weight DMA (v6e needs ~656 FLOP/byte in bf16).
    if n_chunks > 1 and rows >= 2 * 768 and tile_m < 768:
        tm2 = _pick_tm(rows, 768)
        th2 = plan_for_tm(tm2)
        if th2 >= 128:
            tm, th = tm2, th2
            n_chunks = hidden // th
    return tm, th, n_chunks, _pick_sub(th)


def _make_ff_kernel(sub, n_sub, multi_chunk):
    def kernel(x_ref, w1v_ref, w1g_ref, b1v_ref, b1g_ref, w2_ref, b2_ref,
               o_ref, *scratch):
        x = x_ref[...]                                        # (tm, dim), native dtype
        acc = jnp.zeros((x_ref.shape[0], o_ref.shape[1]), jnp.float32)

        # Hidden sub-tiles with static slices: bounds the f32 intermediates at
        # (tm, sub) instead of (tm, th) while the chunk's weights stay resident.
        for s in range(n_sub):
            lo = s * sub
            a = jnp.dot(x, w1v_ref[:, lo:lo + sub], preferred_element_type=jnp.float32)
            a = a + b1v_ref[:, lo:lo + sub].astype(jnp.float32)
            g = jnp.dot(x, w1g_ref[:, lo:lo + sub], preferred_element_type=jnp.float32)
            g = g + b1g_ref[:, lo:lo + sub].astype(jnp.float32)
            # GEGLU with exact erf-GELU (matches torch.nn.functional.gelu default).
            y = a * (0.5 * g * (1.0 + lax.erf(g * jnp.float32(_INV_SQRT2))))
            # Dropout(p=0.0): no-op.
            acc = acc + jnp.dot(y.astype(w2_ref.dtype), w2_ref[lo:lo + sub, :],
                                preferred_element_type=jnp.float32)

        if multi_chunk:
            acc_ref = scratch[0]
            k = pl.program_id(1)

            @pl.when(k == 0)
            def _():
                acc_ref[...] = jnp.zeros_like(acc_ref)

            acc_ref[...] += acc

            @pl.when(k == pl.num_programs(1) - 1)
            def _():
                o_ref[...] = (acc_ref[...]
                              + b2_ref[...].astype(jnp.float32)).astype(o_ref.dtype)
        else:
            # Fully-resident weights: single grid step along hidden -> store directly.
            o_ref[...] = (acc + b2_ref[...].astype(jnp.float32)).astype(o_ref.dtype)

    return kernel


def feed_forward(x, w1, b1, w2, b2, *, tile_m=512):
    """x: (batch, seq, dim). w1: (dim, 2*hidden), b1: (2*hidden,),
       w2: (hidden, dim), b2: (dim,). Returns (batch, seq, dim)."""
    batch, seq, dim = x.shape
    two_hidden = w1.shape[1]
    hidden = two_hidden // 2
    assert w1.shape == (dim, two_hidden) and two_hidden == 2 * hidden
    assert w2.shape == (hidden, dim)
    assert b1.shape == (two_hidden,) and b2.shape == (dim,)

    rows = batch * seq
    x_itemsize = jnp.dtype(x.dtype).itemsize
    w_itemsize = jnp.dtype(w1.dtype).itemsize

    vmem_cap = _vmem_capacity_bytes()
    vmem_limit = int(vmem_cap * 7 // 8)       # ~112 MiB on v5e/v6e, ~56 MiB on v7x

    buffered_ok = _supports_buffered_1()
    buf_factor = 1 if buffered_ok else 2
    tm, th, n_chunks, sub = _plan(rows, dim, hidden, x_itemsize, w_itemsize,
                                  tile_m, vmem_limit, buf_factor)
    if n_chunks > 1 and buf_factor == 1:
        # Chunked weights change every grid step -> they will be double-buffered.
        buf_factor = 2
        tm, th, n_chunks, sub = _plan(rows, dim, hidden, x_itemsize, w_itemsize,
                                      tile_m, vmem_limit, buf_factor)
    n_sub = th // sub
    multi_chunk = n_chunks > 1
    use_single_buf = buffered_ok and not multi_chunk

    # Row tiling; pad only if no divisor-sized tile was found.
    rows_p = _round_up(rows, tm)
    x2d = x.reshape(rows, dim)
    if rows_p != rows:
        x2d = jnp.pad(x2d, ((0, rows_p - rows), (0, 0)))

    # Consume W1/b1 in place: pass them twice with column-block index maps offset by
    # hidden//th for the gate half (no host-side HBM copy of W1). Host split only for
    # hidden not divisible by 128 (toy sizes), where column blocks can't be tiled.
    split_on_host = hidden % 128 != 0
    if split_on_host:
        w1v_in, w1g_in = w1[:, :hidden], w1[:, hidden:]
        b1v_in = b1[:hidden].reshape(1, hidden)
        b1g_in = b1[hidden:].reshape(1, hidden)
        gate_off = 0
    else:
        w1v_in = w1g_in = w1
        b1v_in = b1g_in = b1.reshape(1, two_hidden)
        gate_off = hidden // th
    b2_2d = b2.reshape(1, dim)

    def wspec(shape, imap):
        if use_single_buf:
            return pl.BlockSpec(shape, imap, pipeline_mode=pl.Buffered(1))
        return pl.BlockSpec(shape, imap)

    grid = (rows_p // tm, n_chunks)
    grid_spec = pltpu.PrefetchScalarGridSpec(
        num_scalar_prefetch=0,
        grid=grid,
        in_specs=[
            pl.BlockSpec((tm, dim), lambda i, k: (i, 0)),        # x row tile
            wspec((dim, th), lambda i, k: (0, k)),                # W1 value columns
            wspec((dim, th), lambda i, k: (0, k + gate_off)),     # W1 gate columns
            wspec((1, th), lambda i, k: (0, k)),                  # b1 value columns
            wspec((1, th), lambda i, k: (0, k + gate_off)),       # b1 gate columns
            wspec((th, dim), lambda i, k: (k, 0)),                # W2 row chunk
            wspec((1, dim), lambda i, k: (0, 0)),                 # b2
        ],
        out_specs=pl.BlockSpec((tm, dim), lambda i, k: (i, 0)),
        scratch_shapes=([pltpu.VMEM((tm, dim), jnp.float32)] if multi_chunk else []),
    )

    out2d = pl.pallas_call(
        _make_ff_kernel(sub, n_sub, multi_chunk),
        out_shape=jax.ShapeDtypeStruct((rows_p, dim), x.dtype),
        grid_spec=grid_spec,
        compiler_params=pltpu.CompilerParams(
            dimension_semantics=("parallel", "arbitrary"),
            vmem_limit_bytes=vmem_limit,
        ),
    )(x2d, w1v_in, w1g_in, b1v_in, b1g_in, w2, b2_2d)

    if rows_p != rows:
        out2d = out2d[:rows]
    return out2d.reshape(batch, seq, dim)


def _reference(x, w1, b1, w2, b2):
    h = jnp.einsum("bsd,dh->bsh", x, w1) + b1
    hidden = w1.shape[1] // 2
    a, g = h[..., :hidden], h[..., hidden:]
    y = a * (0.5 * g * (1.0 + lax.erf(g / jnp.sqrt(2.0))))
    return jnp.einsum("bsh,hd->bsd", y, w2) + b2


if __name__ == "__main__":
    # Small shapes consistent with the module: dim=32, mult=4 -> hidden=128.
    batch, seq, dim, mult = 2, 8, 32, 4
    hidden = dim * mult

    key = jax.random.PRNGKey(0)
    kx, kw1, kb1, kw2, kb2 = jax.random.split(key, 5)

    x = jax.random.normal(kx, (batch, seq, dim), dtype=jnp.float32)

    # Deterministic init mimicking nn.Linear (uniform +-1/sqrt(fan_in)).
    lim1 = 1.0 / jnp.sqrt(jnp.float32(dim))
    w1 = jax.random.uniform(kw1, (dim, 2 * hidden), jnp.float32, -lim1, lim1)
    b1 = jax.random.uniform(kb1, (2 * hidden,), jnp.float32, -lim1, lim1)

    lim2 = 1.0 / jnp.sqrt(jnp.float32(hidden))
    w2 = jax.random.uniform(kw2, (hidden, dim), jnp.float32, -lim2, lim2)
    b2 = jax.random.uniform(kb2, (dim,), jnp.float32, -lim2, lim2)

    # float32 run: tight parity check vs reference.
    out = jax.block_until_ready(feed_forward(x, w1, b1, w2, b2))
    ref = _reference(x, w1, b1, w2, b2)
    assert out.shape == (batch, seq, dim)
    assert jnp.allclose(out, ref, atol=1e-5, rtol=1e-5), "f32 mismatch vs reference"

    # bfloat16 run: MXU-native dtype path (no in-kernel upcast of MXU operands).
    # NOTE: y is cast to bf16 before Linear2 (slightly below torch's f32 intermediate,
    # within the stated tolerance).
    xb, w1b, b1b, w2b, b2b = (t.astype(jnp.bfloat16) for t in (x, w1, b1, w2, b2))
    out_bf = jax.block_until_ready(feed_forward(xb, w1b, b1b, w2b, b2b))
    ref_bf = _reference(*(t.astype(jnp.float32) for t in (xb, w1b, b1b, w2b, b2b)))
    assert jnp.allclose(out_bf.astype(jnp.float32), ref_bf, atol=5e-2, rtol=5e-2), \
        "bf16 mismatch vs reference"

    print("KERNEL_OK")
</pallas_src>

<mosaic_0001>
module attributes {stable_mosaic.version = 11 : i64} {
  func.func @_probe(%arg0: i32, %arg1: memref<8x128xf32, #tpu.memory_space<vmem>>, %arg2: memref<8x128xf32, #tpu.memory_space<vmem>>) attributes {dimension_semantics = [#tpu.dimension_semantics<arbitrary>], iteration_bounds = array<i64: 1>, scalar_prefetch = 0 : i64, scratch_operands = 0 : i64, tpu.core_type = #tpu.core_type<tc>, window_params = [{pipeline_mode = #tpu.pipeline_mode<synchronous>, transform_indices = @transform_0, window_bounds = array<i64: 8, 128>}, {pipeline_mode = #tpu.pipeline_mode<synchronous>, transform_indices = @transform_1, window_bounds = array<i64: 8, 128>}]} {
    %c0 = arith.constant 0 : index
    %c0_0 = arith.constant 0 : index
    %0 = vector.load %arg1[%c0, %c0_0] : memref<8x128xf32, #tpu.memory_space<vmem>>, vector<8x128xf32>
    %c0_1 = arith.constant 0 : index
    %c0_2 = arith.constant 0 : index
    %1 = vector.load %arg2[%c0_1, %c0_2] : memref<8x128xf32, #tpu.memory_space<vmem>>, vector<8x128xf32>
    tpu.vector_store %arg2[%c0_1, %c0_2], %0 {strides = array<i32>} : memref<8x128xf32, #tpu.memory_space<vmem>>, vector<8x128xf32>,
    return
  }
  func.func @transform_0(%arg0: i32) -> (i32, i32) {
    %c0_i32 = arith.constant 0 : i32
    %c0_i32_0 = arith.constant 0 : i32
    %c0_i32_1 = arith.constant 0 : i32
    return %c0_i32, %c0_i32_0 : i32, i32
  }
  func.func @transform_1(%arg0: i32) -> (i32, i32) {
    %c0_i32 = arith.constant 0 : i32
    %c0_i32_0 = arith.constant 0 : i32
    %c0_i32_1 = arith.constant 0 : i32
    return %c0_i32, %c0_i32_0 : i32, i32
  }
}

module attributes {stable_mosaic.version = 11 : i64} {
  func.func @kernel(%arg0: i32, %arg1: i32, %arg2: memref<8x32xf32, #tpu.memory_space<vmem>>, %arg3: memref<32x128xf32, #tpu.memory_space<vmem>>, %arg4: memref<32x128xf32, #tpu.memory_space<vmem>>, %arg5: memref<1x128xf32, #tpu.memory_space<vmem>>, %arg6: memref<1x128xf32, #tpu.memory_space<vmem>>, %arg7: memref<128x32xf32, #tpu.memory_space<vmem>>, %arg8: memref<1x32xf32, #tpu.memory_space<vmem>>, %arg9: memref<8x32xf32, #tpu.memory_space<vmem>>) attributes {dimension_semantics = [#tpu.dimension_semantics<parallel>, #tpu.dimension_semantics<arbitrary>], iteration_bounds = array<i64: 2, 1>, scalar_prefetch = 0 : i64, scratch_operands = 0 : i64, tpu.core_type = #tpu.core_type<tc>, window_params = [{transform_indices = @transform_0, window_bounds = array<i64: 8, 32>}, {transform_indices = @transform_1, window_bounds = array<i64: 32, 128>}, {transform_indices = @transform_2, window_bounds = array<i64: 32, 128>}, {transform_indices = @transform_3, window_bounds = array<i64: 1, 128>}, {transform_indices = @transform_4, window_bounds = array<i64: 1, 128>}, {transform_indices = @transform_5, window_bounds = array<i64: 128, 32>}, {pipeline_mode = #tpu.pipeline_mode<synchronous>, transform_indices = @transform_6, window_bounds = array<i64: 1, 32>}, {transform_indices = @transform_7, window_bounds = array<i64: 8, 32>}]} {
    %c0 = arith.constant 0 : index
    %c0_0 = arith.constant 0 : index
    %0 = vector.load %arg2[%c0, %c0_0] : memref<8x32xf32, #tpu.memory_space<vmem>>, vector<8x32xf32>
    %cst = arith.constant 0.000000e+00 : f32
    %1 = vector.broadcast %cst : f32 to vector<8x32xf32>
    %c0_1 = arith.constant 0 : index
    %c0_2 = arith.constant 0 : index
    %2 = vector.load %arg3[%c0_1, %c0_2] : memref<32x128xf32, #tpu.memory_space<vmem>>, vector<32x128xf32>
    %cst_3 = arith.constant dense<0.000000e+00> : vector<8x128xf32>
    %3 = tpu.matmul %0, %2, %cst_3 {dimension_numbers = #tpu.dot_dimension_numbers<[1], [0], [0], [1], [0, 0, 1, 1], [], []>} : vector<8x32xf32>, vector<32x128xf32>, vector<8x128xf32> -> vector<8x128xf32>
    %c0_4 = arith.constant 0 : index
    %c0_5 = arith.constant 0 : index
    %4 = vector.load %arg5[%c0_4, %c0_5] : memref<1x128xf32, #tpu.memory_space<vmem>>, vector<1x128xf32>
    %5 = vector.broadcast %4 : vector<1x128xf32> to vector<8x128xf32>
    %6 = arith.addf %3, %5 : vector<8x128xf32>
    %c0_6 = arith.constant 0 : index
    %c0_7 = arith.constant 0 : index
    %7 = vector.load %arg4[%c0_6, %c0_7] : memref<32x128xf32, #tpu.memory_space<vmem>>, vector<32x128xf32>
    %cst_8 = arith.constant dense<0.000000e+00> : vector<8x128xf32>
    %8 = tpu.matmul %0, %7, %cst_8 {dimension_numbers = #tpu.dot_dimension_numbers<[1], [0], [0], [1], [0, 0, 1, 1], [], []>} : vector<8x32xf32>, vector<32x128xf32>, vector<8x128xf32> -> vector<8x128xf32>
    %c0_9 = arith.constant 0 : index
    %c0_10 = arith.constant 0 : index
    %9 = vector.load %arg6[%c0_9, %c0_10] : memref<1x128xf32, #tpu.memory_space<vmem>>, vector<1x128xf32>
    %10 = vector.broadcast %9 : vector<1x128xf32> to vector<8x128xf32>
    %11 = arith.addf %8, %10 : vector<8x128xf32>
    %cst_11 = arith.constant 5.000000e-01 : f32
    %12 = vector.broadcast %cst_11 : f32 to vector<8x128xf32>
    %13 = arith.mulf %12, %11 : vector<8x128xf32>
    %cst_12 = arith.constant 0.707106769 : f32
    %14 = vector.broadcast %cst_12 : f32 to vector<8x128xf32>
    %15 = arith.mulf %11, %14 : vector<8x128xf32>
    %16 = math.erf %15 : vector<8x128xf32>
    %cst_13 = arith.constant 1.000000e+00 : f32
    %17 = vector.broadcast %cst_13 : f32 to vector<8x128xf32>
    %18 = arith.addf %17, %16 : vector<8x128xf32>
    %19 = arith.mulf %13, %18 : vector<8x128xf32>
    %20 = arith.mulf %6, %19 : vector<8x128xf32>
    %c0_14 = arith.constant 0 : index
    %c0_15 = arith.constant 0 : index
    %21 = vector.load %arg7[%c0_14, %c0_15] : memref<128x32xf32, #tpu.memory_space<vmem>>, vector<128x32xf32>
    %cst_16 = arith.constant dense<0.000000e+00> : vector<8x32xf32>
    %22 = tpu.matmul %20, %21, %cst_16 {dimension_numbers = #tpu.dot_dimension_numbers<[1], [0], [0], [1], [0, 0, 1, 1], [], []>} : vector<8x128xf32>, vector<128x32xf32>, vector<8x32xf32> -> vector<8x32xf32>
    %23 = arith.addf %1, %22 : vector<8x32xf32>
    %c0_17 = arith.constant 0 : index
    %c0_18 = arith.constant 0 : index
    %24 = vector.load %arg8[%c0_17, %c0_18] : memref<1x32xf32, #tpu.memory_space<vmem>>, vector<1x32xf32>
    %25 = vector.broadcast %24 : vector<1x32xf32> to vector<8x32xf32>
    %26 = arith.addf %23, %25 : vector<8x32xf32>
    %c0_19 = arith.constant 0 : index
    %c0_20 = arith.constant 0 : index
    %27 = vector.load %arg9[%c0_19, %c0_20] : memref<8x32xf32, #tpu.memory_space<vmem>>, vector<8x32xf32>
    tpu.vector_store %arg9[%c0_19, %c0_20], %26 {strides = array<i32>} : memref<8x32xf32, #tpu.memory_space<vmem>>, vector<8x32xf32>,
    return
  }
  func.func @transform_0(%arg0: i32, %arg1: i32) -> (i32, i32) {
    %c0_i32 = arith.constant 0 : i32
    %c0_i32_0 = arith.constant 0 : i32
    return %arg0, %c0_i32 : i32, i32
  }
  func.func @transform_1(%arg0: i32, %arg1: i32) -> (i32, i32) {
    %c0_i32 = arith.constant 0 : i32
    %c0_i32_0 = arith.constant 0 : i32
    return %c0_i32, %arg1 : i32, i32
  }
  func.func @transform_2(%arg0: i32, %arg1: i32) -> (i32, i32) {
    %c1_i32 = arith.constant 1 : i32
    %0 = arith.addi %arg1, %c1_i32 : i32
    %c0_i32 = arith.constant 0 : i32
    %c0_i32_0 = arith.constant 0 : i32
    return %c0_i32, %0 : i32, i32
  }
  func.func @transform_3(%arg0: i32, %arg1: i32) -> (i32, i32) {
    %c0_i32 = arith.constant 0 : i32
    %c0_i32_0 = arith.constant 0 : i32
    return %c0_i32, %arg1 : i32, i32
  }
  func.func @transform_4(%arg0: i32, %arg1: i32) -> (i32, i32) {
    %c1_i32 = arith.constant 1 : i32
    %0 = arith.addi %arg1, %c1_i32 : i32
    %c0_i32 = arith.constant 0 : i32
    %c0_i32_0 = arith.constant 0 : i32
    return %c0_i32, %0 : i32, i32
  }
  func.func @transform_5(%arg0: i32, %arg1: i32) -> (i32, i32) {
    %c0_i32 = arith.constant 0 : i32
    %c0_i32_0 = arith.constant 0 : i32
    return %arg1, %c0_i32 : i32, i32
  }
  func.func @transform_6(%arg0: i32, %arg1: i32) -> (i32, i32) {
    %c0_i32 = arith.constant 0 : i32
    %c0_i32_0 = arith.constant 0 : i32
    %c0_i32_1 = arith.constant 0 : i32
    return %c0_i32, %c0_i32_0 : i32, i32
  }
  func.func @transform_7(%arg0: i32, %arg1: i32) -> (i32, i32) {
    %c0_i32 = arith.constant 0 : i32
    %c0_i32_0 = arith.constant 0 : i32
    return %arg0, %c0_i32 : i32, i32
  }
}

</mosaic_0001>

<bundles_post_ra>
// kernel: tpu_custom_call.1
= control target key start
LH: loop header
LB: loop body
LE: loop exit
PB: predicated region body
PF: predicated region fallthrough
CT: control target
= control target key end

     0   :  { %6 = vsyncpa [#allocation3], 0  ;;  %s114_s0 = inlined_call_operand.hbm [shape: f32[8,128], index: 0, kind: input, shape index: {}]   ;;  %s115_s1 = inlined_call_operand.hbm [shape: f32[8,128], index: 1, kind: output, shape index: {}]  }
   0x1   :  { %7 = vsyncpa [#allocation4], 0  ;;  %s13_s8 = sshll.u32 %s114_s0, 4  ;;  %s96_s9 = smov [#allocation2]   ;;  %s14_s8 = int_to_ptr.hbm [resolvable:$true] %s13_s8 }
   0x2   :  { %s15_s10 = sshll.u32 %s96_s9, 4  ;;  %s16_s10 = int_to_ptr.vmem [resolvable:$true] %s15_s10 }
   0x3   :  { %18 = dma.hbm_to_vmem [thread:$0]  %s14_s8, 128, %s16_s10, [#allocation3]  }
   0x4   :  { %92 = dma.done.wait [#allocation3], 128  }
   0x5   :  { %93 = vsyncadd [#allocation3], 4294967168  ;;  %s97_s11 = smov [#allocation5]   ;;  %s32_s15 = sshll.u32 %s115_s1, 4  ;;  %v23_v0 = vld [vmem:[#allocation2] sm:$0xff]  ;;  %s33_s15 = int_to_ptr.hbm [resolvable:$true] %s32_s15 }
   0x6   :  { %s30_s12 = sshll.u32 %s97_s11, 4  ;;  %24 = vst [vmem:[#allocation5] sm:$0xff] %v23_v0  ;;  %s31_s12 = int_to_ptr.vmem [resolvable:$true] %s30_s12 }
   0x7   :  { %35 = dma.vmem_to_hbm [thread:$0]  %s31_s12, 128, %s33_s15, [#allocation4]  }
   0x8   :  { %94 = dma.done.wait [#allocation4], 128  }
   0x9   :  { %95 = vsyncadd [#allocation4], 4294967168 }
   0xa   :  { %40 = vsyncpa [#allocation3], 1 }
   0xb   :  { %41 = vsyncpa [#allocation4], 1 }

// kernel: tpu_custom_call.1
= control target key start
LH: loop header
LB: loop body
LE: loop exit
PB: predicated region body
PF: predicated region fallthrough
CT: control target
= control target key end

     0   :  { %12 = vsyncpa [#allocation5], 0  ;;  %s1154_s0 = inlined_call_operand.vmem [shape: f32[16,32], index: 0, kind: input, shape index: {}]   ;;  %s1155_s1 = inlined_call_operand.vmem [shape: f32[32,256], index: 1, kind: input, shape index: {}]   ;;  %s1156_s2 = inlined_call_operand.vmem [shape: f32[32,256], index: 2, kind: input, shape index: {}]   ;;  %s1157_s3 = inlined_call_operand.vmem [shape: f32[1,256], index: 3, kind: input, shape index: {}]   ;;  %s1158_s4 = inlined_call_operand.vmem [shape: f32[1,256], index: 4, kind: input, shape index: {}]   ;;  %s1159_s5 = inlined_call_operand.vmem [shape: f32[128,32], index: 5, kind: input, shape index: {}]   ;;  %s1160_s6 = inlined_call_operand.vmem [shape: f32[1,32], index: 6, kind: input, shape index: {}]   ;;  %s1161_s7 = inlined_call_operand.hbm [shape: f32[16,32], index: 7, kind: output, shape index: {}]  }
   0x1   :  { %14 = vsyncpa [#allocation5 + $0x1], 0  ;;  %s961_s24 = smov 0   ;;  %s963_s25 = smov 0  }
   0x2   :  { %s965_s26 = smov 0   ;;  %s967_s27 = smov 0  }
   0x3   :  { %s969_s28 = smov 0   ;;  %s971_s29 = smov 0  }
   0x4 LB: > { %s757_s30 = sadd.s32 4294967295, %s919_s29   ;;  %s758_s8 = sadd.s32 4294967294, %s919_s29   ;;  %s919_s29 = sphi %s971_s29, %s20_s29   ;;  %s915_s28 = sphi %s969_s28, %s1169_s28   ;;  %s911_s27 = sphi %s967_s27, %s1168_s27   ;;  %s907_s26 = sphi %s965_s26, %s1167_s26   ;;  %s903_s25 = sphi %s963_s25, %s1166_s25   ;;  %s899_s24 = sphi %s961_s24, %s1165_s24  }
   0x5   : > { %s32_s9 = sadd.s32 1, %s915_s28  ;;  %s220_s10 = sadd.s32 1, %s907_s26 }
   0x6   : > { %p34_p0 = scmp.ge.s32.totalorder %s32_s9, 2  ;;  %p230_p1 = scmp.ne.s32.totalorder %s907_s26, %s903_s25 }
   0x7   : > { %p231_p2 = scmp.eq.s32.totalorder %s757_s30, 1  ;;  %p236_p3 = scmp.ne.s32.totalorder %s903_s25, %s899_s24 }
   0x8   : > { %s1171_s9 = smov (%p34_p0, %s32_s9), 0  ;;  %p237_p5 = scmp.eq.s32.totalorder %s758_s8, 1 }
   0x9   : > { %p1001_p4 = por %p231_p2, %p230_p1  ;;  %s217_s12 = ssub.s32 %s915_s28, %s1171_s9 }
   0xa   : > { %p759_p6 = scmp.ge.s32.totalorder %s919_s29, 1  ;;  %p218_p7 = scmp.eq.s32.totalorder %s217_s12, 0 }
   0xb   : > { %p1008_p8 = por %p237_p5, %p236_p3  ;;  %p244_p9 = scmp.lt.s32.totalorder %s919_s29, 3 }
   0xc   : > { %s1014_s14 = scalar_select %p218_p7, %s907_s26, %s220_s10  }
   0xd   : > { %p1016_p10 = pnand %p759_p6, %p244_p9 }
   0xe   : > { %p760_p11 = scmp.ne.s32.totalorder (!%p1016_p10), %s757_s30, 0 }
   0xf   : > { %248 = sbr.rel (%p1016_p10) target bundleno = 40 (0x28), region = 12 }
  0x14   : > { %252 = sbr.rel (%p760_p11) target bundleno = 30 (0x1e), region = 16 }
  0x19   : > { %v289_v0 = vld [vmem:[%s1155_s1] sm:$0xff]  ;;  %v291_v1 = vld [vmem:[%s1155_s1 + $0x10] sm:$0xff] }
  0x1a   : > { %v293_v2 = vld [vmem:[%s1155_s1 + $0x20] sm:$0xff]  ;;  %290 = vst [vmem:[#allocation2 + $0x10] sm:$0xff] %v289_v0  ;;  %v295_v3 = vld [vmem:[%s1155_s1 + $0x30] sm:$0xff] }
  0x1b   : > { %292 = vst [vmem:[#allocation2] sm:$0xff] %v291_v1 }
  0x1c   : > { %294 = vst [vmem:[#allocation2 + $0x18] sm:$0xff] %v293_v2 }
  0x1d   : > { %296 = vst [vmem:[#allocation2 + $0x8] sm:$0xff] %v295_v3 }
  0x1e PF: > { %302 = sbr.rel (%p760_p11) target bundleno = 40 (0x28), region = 54 }
  0x23   : > { %v762_v4 = vld [vmem:[%s1156_s2 + $0x8] sm:$0xff]  ;;  %v763_v5 = vld [vmem:[%s1156_s2 + $0x18] sm:$0xff] }
  0x24   : > { %v764_v6 = vld [vmem:[%s1156_s2 + $0x28] sm:$0xff]  ;;  %341 = vst [vmem:[#allocation3] sm:$0xff] %v762_v4  ;;  %v765_v7 = vld [vmem:[%s1156_s2 + $0x38] sm:$0xff] }
  0x25   : > { %343 = vst [vmem:[#allocation3 + $0x18] sm:$0xff] %v763_v5 }
  0x26   : > { %345 = vst [vmem:[#allocation3 + $0x8] sm:$0xff] %v764_v6 }
  0x27   : > { %347 = vst [vmem:[#allocation3 + $0x10] sm:$0xff] %v765_v7 }
  0x28 PF: > { %393 = sbr.rel (%p1016_p10) target bundleno = 372 (0x174), region = 116  ;;  %p438_p12 = scmp.lt.s32.totalorder (!%p1016_p10), %s911_s27, 1 }
  0x29   : > { %s435_s22 = sand.u32 (!%p1016_p10), 1, %s903_s25  }
  0x2a   : > { %s771_s15 = sshll.u32 (!%p1016_p10), %s435_s22, 3 }
  0x2b   : > { %s437_s17 = scalar_lea.vmem (!%p1016_p10), [#allocation4], %s771_s15  ;;  %s861_s15 = scalar_lea.hbm (!%p1016_p10), %s1161_s7, 16 }
  0x2c   : > { %s617_s18 = sshll.u32 (!%p1016_p10), %s437_s17, 4  ;;  %s618_s18 = int_to_ptr.vmem [resolvable:$true] %s617_s18 }
  0x2d   : > { %v492_v9 = vld [vmem:[#allocation3 + $0x8] sm:$0xff]  ;;  %v460_v11 = vld [vmem:[#allocation2 + $0x18] sm:$0xff]  ;;  %s439_s20 = scalar_select %p438_p12, %s911_s27, 1  ;;  %v459_v13 = vld [vmem:[#allocation2] sm:$0xff]  ;;  %vm466_vm0 = vcmask 261120  }
  0x2e   : > { %v493_v8 = vld [vmem:[#allocation3 + $0x10] sm:$0xff]  ;;  %v461_v10 = vld [vmem:[#allocation2 + $0x8] sm:$0xff]  ;;  %v491_v12 = vld [vmem:[#allocation3 + $0x18] sm:$0xff] }
  0x2f   : > { %510 = vmatpush.msra.mxu1 %v493_v8  ;;  %482 = vmatpush.msra.mxu0 %v461_v10  ;;  %v490_v14 = vld [vmem:[#allocation3] sm:$0xff]  ;;  %s772_s21 = sshll.u32 %s439_s20, 3  ;;  %v458_v15 = vld [vmem:[#allocation2 + $0x10] sm:$0xff]  ;;  %v578_v17 = vld [vmem:[%s1159_s5 + $0x78] sm:$0xff]  ;;  %s605_s20 = scalar_lea.sflag [#allocation5], %s435_s22 }
  0x30   : > { %s441_s23 = scalar_lea.vmem %s1154_s0, %s772_s21  ;;  %583 = vmatpush.msra.mxu2 %v578_v17  ;;  %v577_v18 = vld [vmem:[%s1159_s5 + $0x70] sm:$0xff]  ;;  %v576_v19 = vld [vmem:[%s1159_s5 + $0x68] sm:$0xff]  ;;  %v836_v20 = vld [vmem:[%s1158_s4 + $0x1] ss:$0 sm:$0xff] }
  0x31   : > { %511 = vmatpush.msra.mxu1 %v492_v9  ;;  %483 = vmatpush.msra.mxu0 %v460_v11  ;;  %v457_v16 = vld [vmem:[%s441_s23] sm:$0xff]  ;;  %v574_v22 = vld [vmem:[%s1159_s5 + $0x58] sm:$0xff]  ;;  %v573_v24 = vld [vmem:[%s1159_s5 + $0x50] sm:$0xff]  ;;  %s778_s23 = sshll.u32 %s911_s27, 3 }
  0x32   : > { %584 = vmatpush.msra.mxu2 %v577_v18  ;;  %v575_v21 = vld [vmem:[%s1159_s5 + $0x60] sm:$0xff]  ;;  %v572_v26 = vld [vmem:[%s1159_s5 + $0x48] sm:$0xff]  ;;  %v570_v30 = vld [vmem:[%s1159_s5 + $0x38] sm:$0xff]  ;;  %s615_s10 = scalar_lea.hbm %s1161_s7, %s778_s23 }
  0x33   : > { %512 = vmatpush.msra.mxu1 %v491_v12  ;;  %484 = vmatpush.msra.mxu0 %v459_v13  ;;  %v571_v28 = vld [vmem:[%s1159_s5 + $0x40] sm:$0xff]  ;;  %v569_v32 = vld [vmem:[%s1159_s5 + $0x30] sm:$0xff]  ;;  %v568_v35 = vld [vmem:[%s1159_s5 + $0x28] sm:$0xff]  ;;  %s619_s19 = sshll.u32 %s615_s10, 4  ;;  %s620_s19 = int_to_ptr.hbm [resolvable:$true] %s619_s19 }
  0x34   : > { %585 = vmatpush.msra.mxu2 %v576_v19  ;;  %v567_v38 = vld [vmem:[%s1159_s5 + $0x20] sm:$0xff]  ;;  %v566_v41 = vld [vmem:[%s1159_s5 + $0x18] sm:$0xff]  ;;  %v565_v44 = vld [vmem:[%s1159_s5 + $0x10] sm:$0xff]  ;;  %s855_s27 = sshra.s32 %s620_s19, 4  ;;  %s856_s27 = int_to_ptr.hbm [resolvable:$true] %s855_s27 }
  0x35   : > { %513 = vmatpush.msra.mxu1 %v490_v14  ;;  %485 = vmatpush.msra.mxu0 %v458_v15  ;;  %v564_v46 = vld [vmem:[%s1159_s5 + $0x8] sm:$0xff]  ;;  %v563_v49 = vld [vmem:[%s1159_s5] sm:$0xff]  ;;  %s857_s21 = scalar_lea.hbm %s856_s27, 8  ;;  %p862_p2 = scmp.lt.s32.totalorder %s856_s27, %s1161_s7 }
  0x36   : > { %775 = vmatmul.msk.f32.vlgmr.msra.gmra.mxu1 %vm466_vm0, %v457_v16  ;;  %773 = vmatmul.msk.f32.vlgmr.msra.gmra.mxu0 %vm466_vm0, %v457_v16  ;;  %v837_v6 = vld [vmem:[%s1157_s3] ss:$0 sm:$0xff]  ;;  %p858_p13 = scmp.ne.s32.totalorder %s856_s27, %s857_s21  ;;  %p863_p3 = scmp.lt.s32.totalorder %s861_s15, %s857_s21 }
  0x37   : > { %586 = vmatpush.msra.mxu2 %v575_v21  ;;  %v838_v15 = vld [vmem:[%s1160_s6] ss:$0 sm:$0xff] }
  0x38   : > { %p859_p0 = pnand %p858_p13, %p1001_p4  ;;  %p864_p5 = por %p863_p3, %p862_p2 }
  0x39   : > { %587 = vmatpush.msra.mxu2 %v574_v22 }
  0x3a   : > { %p860_p1 = pneg %p859_p0 }
  0x3b   : > { %588 = vmatpush.msra.mxu2 %v573_v24 }
  0x3c   : > { %p865_p6 = pnand %p864_p5, %p860_p1 }
  0x3d   : > { %589 = vmatpush.msra.mxu2 %v572_v26 }
  0x3f   : > { %590 = vmatpush.msra.mxu2 %v571_v28 }
  0x41   : > { %591 = vmatpush.msra.mxu2 %v570_v30 }
  0x43   : > { %592 = vmatpush.msra.mxu2 %v569_v32 }
  0x45   : > { %593 = vmatpush.msra.mxu2 %v568_v35 }
  0x47   : > { %594 = vmatpush.msra.mxu2 %v567_v38 }
  0x49   : > { %595 = vmatpush.msra.mxu2 %v566_v41 }
  0x4b   : > { %596 = vmatpush.msra.mxu2 %v565_v44 }
  0x4d   : > { %597 = vmatpush.msra.mxu2 %v564_v46 }
  0x4f   : > { %598 = vmatpush.msra.mxu2 %v563_v49 }
  0xb3   : > { %v515_v23 = vpop.f32.mrf.mxu1  ;;  %v487_v8 = vpop.f32.mrf.mxu0 }
  0xb4   : > { %v1076_v25 = vadd.f32 %v836_v20, %v515_v23  ;;  %v488_v11 = vadd.f32 %v837_v6, %v487_v8 }
  0xb6   : > { %v519_v27 = vmul.f32 0.70710677, %v1076_v25  ;;  %v518_v10 = vmul.f32 0.5, %v1076_v25 }
  0xb8   : > { %v520_v29 = vmul.f32 %v519_v27, %v519_v27 }
  0xba   : > { %v521_v31 = vmin.f32 %v520_v29, 16.0 }
  0xbc   : > { %v522_v33 = vmul.f32 2.1237322e-06, %v521_v31  ;;  %v533_v34 = vmul.f32 3.8918573e-05, %v521_v31 }
  0xbe   : > { %v523_v36 = vadd.f32 0.00028619796, %v522_v33  ;;  %v534_v37 = vadd.f32 0.001143296, %v533_v34 }
  0xc0   : > { %v524_v39 = vmul.f32 %v523_v36, %v521_v31  ;;  %v535_v40 = vmul.f32 %v534_v37, %v521_v31 }
  0xc2   : > { %v536_v42 = vadd.f32 0.014752088, %v535_v40  ;;  %v525_v43 = vadd.f32 0.0036580483, %v524_v39 }
  0xc4   : > { %v537_v45 = vmul.f32 %v536_v42, %v521_v31  ;;  %v526_v48 = vmul.f32 %v525_v43, %v521_v31 }
  0xc6   : > { %v538_v47 = vadd.f32 0.112945676, %v537_v45  ;;  %v527_v52 = vadd.f32 0.05243302, %v526_v48 }
  0xc8   : > { %v539_v50 = vmul.f32 %v538_v47, %v521_v31  ;;  %v528_v55 = vmul.f32 %v527_v52, %v521_v31 }
  0xca   : > { %v540_v51 = vadd.f32 0.4994258, %v539_v50  ;;  %v529_v56 = vadd.f32 0.18741608, %v528_v55 }
  0xcc   : > { %v541_v53 = vmul.f32 %v540_v51, %v521_v31  ;;  %v530_v58 = vmul.f32 %v529_v56, %v521_v31 }
  0xce   : > { %v542_v54 = vadd.f32 1.0, %v541_v53  ;;  %v531_v62 = vadd.f32 1.1283791, %v530_v58 }
  0xd0   : > { %839 = vrcp.f32 %v542_v54  ;;  %v554_v61 = vand.u32 2147483648, %v542_v54  ;;  %v552_v0 = vand.u32 2147483647, %v542_v54  ;;  %vm548_vm2 = vweird.f32 %v542_v54 }
  0xd1   : > { %v532_v3 = vmul.f32 %v531_v62, %v519_v27 }
  0xd2   : > { %v555_v2 = vor.u32 1.1754944e-38, %v554_v61  ;;  %vm553_vm4 = vcmp.eq.f32.partialorder %v552_v0, 8.507059e+37 }
  0xd6   : > { %v840_v57 = vpop.eup %839 }
  0xd7   : > { %v544_v59 = vmul.f32 %v840_v57, %v542_v54  ;;  %vm549_vm1 = vweird.f32 %v840_v57 }
  0xd8   : > { %vm550_vm3 = vmor %vm548_vm2, %vm549_vm1 }
  0xd9   : > { %v545_v60 = vsub.f32 1.0, %v544_v59 }
  0xdb   : > { %v546_v63 = vmul.f32 %v840_v57, %v545_v60 }
  0xdd   : > { %v547_v1 = vadd.f32 %v840_v57, %v546_v63 }
  0xdf   : > { %v551_v4 = vsel %vm550_vm3, %v840_v57, %v547_v1 }
  0xe0   : > { %v556_v5 = vsel %vm553_vm4, %v555_v2, %v551_v4 }
  0xe1   : > { %v557_v7 = vmul.f32 %v556_v5, %v532_v3 }
  0xe3   : > { %v776_v9 = vclamps-f32 %v557_v7, 1.0 }
  0xe5   : > { %v560_v12 = vadd.f32 1.0, %v776_v9 }
  0xe7   : > { %v561_v13 = vmul.f32 %v560_v12, %v518_v10 }
  0xe9   : > { %v562_v14 = vmul.f32 %v561_v13, %v488_v11 }
  0xeb   : > { %599 = vmatmul.f32.vlgmr.msra.gmra.mxu2 %v562_v14 }
 0x16e   : > { %v600_v16 = vpop.f32.mrf.mxu2 }
 0x16f   : > { %v601_v17 = vadd.f32 %v838_v15, %v600_v16 }
 0x171   : > { %603 = vst.msk [vmem:[%s437_s17] sm:$0xff] %vm466_vm0, %v601_v17 }
 0x172   : > { %868 = shalt.err (!%p865_p6)
}
 0x173   : > { %781 = dma.vmem_to_hbm [thread:$0]  (%p1001_p4), %s618_s18, 128, %s620_s19, %s605_s20  }
 0x174 PF: > { %p787_p7 = scmp.ge.s32.totalorder %s919_s29, 2  ;;  %s631_s22 = sand.u32 1, %s899_s24  }
 0x175   : > { %s632_s12 = scalar_lea.sflag [#allocation5], %s631_s22 }
 0x176   : > { %p784_p9 = pnand %p787_p7, %p1008_p8 }
 0x178   : > { %p785_p10 = pneg %p784_p9 }
 0x17a   : > { %894 = dma.done.wait (%p785_p10), %s632_s12, 128  }
 0x17b   : > { %896 = vsyncadd (%p785_p10), %s632_s12, 4294967168  ;;  %s20_s29 = sadd.s32 1, %s919_s29   ;;  %s1165_s24 = smov %s903_s25 }
 0x17c   : > { %p17_p11 = scmp.ge.s32.totalorder %s20_s29, 4   ;;  %s1166_s25 = smov %s907_s26 }
 0x17d   : > { %s1167_s26 = smov %s1014_s14  ;;  %s1168_s27 = smov %s915_s28 }
 0x17e   : > { %s1169_s28 = smov %s1171_s9  ;;  %19 = sbr.rel (!%p17_p11) target bundleno = 4 (0x4), region = 178 }
 0x183   :  { %638 = vsyncpa [#allocation5], 1 }
 0x184   :  { %640 = vsyncpa [#allocation5 + $0x1], 1 }

</bundles_post_ra>
